<compile_context>
chip_gen: v7x
topology: tpu7x:2x2x1
jax: 0.10.0
libtpu: 0.0.40
codegen_flags: <defaults>
</compile_context>

<pallas_src>
import math
import numpy as np
import jax
import jax.numpy as jnp
from jax import lax
from jax.experimental import pallas as pl
from jax.experimental.pallas import tpu as pltpu

WINDOW_SIZE = 11
SIGMA = 1.5
C1 = 0.01 ** 2
C2 = 0.03 ** 2


def _gaussian_1d(window_size, sigma):
    g = np.array(
        [math.exp(-((x - window_size // 2) ** 2) / float(2 * sigma ** 2))
         for x in range(window_size)],
        dtype=np.float64,
    )
    return (g / g.sum()).astype(np.float32)


# Deterministic "parameter" of the module: the normalized 1-D Gaussian. The PyTorch
# 2-D window is its outer product, so the depthwise conv is exactly the separable
# row/column 1-D conv implemented below as Toeplitz matmuls.
G1D = _gaussian_1d(WINDOW_SIZE, SIGMA)


def _round_up(x, m):
    return (x + m - 1) // m * m


def _same_conv_matrix(n, taps):
    """Banded Toeplitz M with (M @ x) == zero-padded 'same' 1-D conv of x with taps.

    The taps are symmetric, so M is symmetric and also valid for right-multiplies.
    """
    ws = len(taps)
    pad = ws // 2
    m = np.zeros((n, n), dtype=np.float32)
    for i in range(n):
        for k in range(ws):
            j = i + k - pad
            if 0 <= j < n:
                m[i, j] = float(taps[k])
    return m


def _tpu_budget():
    """Generation-aware (per-input block cap, vmem-limit cap) in bytes."""
    kind = ""
    try:
        kind = jax.devices()[0].device_kind.lower()
    except Exception:
        pass
    if "v7" in kind or "7x" in kind:
        # v7x: 64 MiB physical VMEM per TensorCore -> keep blocks small.
        return 3 << 20, 56 << 20
    # v5e / v6e: 128 MiB VMEM -> bigger blocks amortize the ~0.35us/step overhead.
    return 8 << 20, 100 << 20


def _choose_pack(n_planes, h, w, max_block_bytes):
    """Pick P = number of (H, W) planes packed side-by-side along the lane axis.

    Preference: lane-dense PW (multiple of 128) > at least 2 grid blocks (feeds both
    v7x TensorCores) > PW multiple of 256 (fills the 256-wide MXU on v6e/v7x) >
    larger PW (fewer, bigger blocks).
    """
    best_p, best_key = 1, None
    for p in range(1, n_planes + 1):
        if n_planes % p:
            continue
        pw = p * w
        if p > 1 and (pw > 1024 or p * h * w * 4 > max_block_bytes):
            break
        g = n_planes // p
        key = (pw % 128 == 0, g >= 2, pw % 256 == 0, pw)
        if best_key is None or key > best_key:
            best_p, best_key = p, key
    return best_p


def _make_ssim_kernel(h, hp, w, wp, fuse_vertical, needs_mask):
    """h/w: original plane dims; hp/wp: padded dims; kernel works on (hp, P*wp)."""

    def kernel(x1_ref, x2_ref, twbd_ref, tv_ref, out_ref, s_ref):
        x1 = x1_ref[...]                       # (hp, PWP)
        x2 = x2_ref[...]

        # Stage the five conv inputs at aligned sublane offsets in one VMEM scratch
        # (replaces the previous per-step jnp.concatenate copy).
        s_ref[0 * hp:1 * hp, :] = x1
        s_ref[1 * hp:2 * hp, :] = x2
        s_ref[2 * hp:3 * hp, :] = x1 * x1
        s_ref[3 * hp:4 * hp, :] = x2 * x2
        s_ref[4 * hp:5 * hp, :] = x1 * x2

        # Horizontal Gaussian pass for all five slabs: one MXU matmul against the
        # block-diagonal per-plane 'same'-conv matrix.
        y = jnp.dot(s_ref[...], twbd_ref[...], preferred_element_type=jnp.float32)

        # Vertical Gaussian pass.
        if fuse_vertical:
            # One (5hp, 5hp) block-diag matmul: a single MXU weight push with
            # contraction depth 5hp instead of five shallow K=hp matmuls.
            conv = jnp.dot(tv_ref[...], y, preferred_element_type=jnp.float32)
            mu1, mu2, e11, e22, e12 = (
                conv[t * hp:(t + 1) * hp, :] for t in range(5))
        else:
            th = tv_ref[...]
            mu1, mu2, e11, e22, e12 = (
                jnp.dot(th, y[t * hp:(t + 1) * hp, :],
                        preferred_element_type=jnp.float32)
                for t in range(5))

        mu1_sq = mu1 * mu1
        mu2_sq = mu2 * mu2
        mu1_mu2 = mu1 * mu2
        sigma1_sq = e11 - mu1_sq
        sigma2_sq = e22 - mu2_sq
        sigma12 = e12 - mu1_mu2

        num = (2.0 * mu1_mu2 + C1) * (2.0 * sigma12 + C2)
        den = (mu1_sq + mu2_sq + C1) * (sigma1_sq + sigma2_sq + C2)
        # TODO(synk): pl.reciprocal(approx=True) (+ one Newton step) once the
        # accuracy budget is confirmed; kept exact to hold the 1e-5 tolerance.
        ssim_map = num * pl.reciprocal(den, approx=False)

        if needs_mask:
            # Zero the padded rows/lanes; otherwise they bias the mean (zero-padded
            # pixels evaluate to ssim = C1*C2/(C1*C2) = 1).
            row = lax.broadcasted_iota(jnp.int32, ssim_map.shape, 0)
            lane = lax.broadcasted_iota(jnp.int32, ssim_map.shape, 1)
            valid = (row < h) & ((lane % wp) < w)
            ssim_map = jnp.where(valid, ssim_map, 0.0)

        # Lane-dense partial: reduce only over sublanes here (cheap XLU reduce),
        # write an unmasked (1, PWP) row; lanes are reduced in the wrapper.
        out_ref[...] = jnp.sum(ssim_map, axis=0, keepdims=True)

    return kernel


def ssim_loss(img1, img2):
    """Pallas SSIM (window_size=11, size_average=True). img1/img2: (B, C, H, W)."""
    assert img1.shape == img2.shape
    B, C, H, W = img1.shape
    N = B * C

    max_block_bytes, vmem_cap = _tpu_budget()

    # Pad to vreg-friendly sizes: H to a multiple of 8 (sublanes), W to a multiple of
    # 8 so packing can reach a 128-multiple lane width. Padded pixels are zero and
    # are masked out of the sum inside the kernel.
    HP = _round_up(H, 8)
    WP = _round_up(W, 8)
    needs_mask = (HP != H) or (WP != W)

    P = _choose_pack(N, HP, WP, max_block_bytes)
    G = N // P
    PWP = P * WP

    def pack(x):
        x = x.astype(jnp.float32)
        if needs_mask:
            x = jnp.pad(x, ((0, 0), (0, 0), (0, HP - H), (0, WP - W)))
        x = x.reshape(G, P, HP, WP)
        # Put the P packed planes side by side along the lane axis -> (G, HP, P*WP).
        return jnp.transpose(x, (0, 2, 1, 3)).reshape(G, HP, PWP)

    x1 = pack(img1)
    x2 = pack(img2)

    m_w = _same_conv_matrix(WP, G1D)                                  # (WP, WP)
    m_h = _same_conv_matrix(HP, G1D)                                  # (HP, HP)
    twbd = jnp.asarray(np.kron(np.eye(P, dtype=np.float32), m_w))     # (PWP, PWP)

    # Fuse the five vertical K=HP matmuls into one K=5*HP block-diagonal matmul while
    # 5*HP is small enough to stay a single deep MXU pass; for large H the per-slab
    # matmuls already have enough contraction depth (and the 5x dense-FLOP inflation
    # of the kron would dominate).
    fuse_vertical = (5 * HP) <= 512
    if fuse_vertical:
        tv = jnp.asarray(np.kron(np.eye(5, dtype=np.float32), m_h))   # (5HP, 5HP)
    else:
        tv = jnp.asarray(m_h)                                         # (HP, HP)

    # TODO(synk): for planes too large for v7x's 64 MiB VMEM, add a row-tiling grid
    # axis with an 11-row halo (rectangular banded T_h of shape (TILE_H, TILE_H+10)).
    # TODO(synk): optional bf16 matmul operands (f32 accumulate) once validated
    # against the accuracy budget.

    # Rough VMEM budget: double-buffered image blocks, resident conv matrices, the
    # (5HP, PWP) staging scratch and live epilogue temps. Never clamp below need.
    plane_bytes = HP * PWP * 4
    need = (2 * 2 * plane_bytes                      # x1, x2 (double-buffered)
            + (twbd.size + tv.size) * 4              # conv matrices (resident)
            + 5 * plane_bytes                        # staging scratch
            + 24 * plane_bytes                       # y, conv, epilogue temps
            + 2 * PWP * 4)                           # partial-sum output
    vmem_limit = int(min(max(2 * need, 16 << 20), vmem_cap))
    vmem_limit = max(vmem_limit, int(need))

    def run(single_buffer_consts):
        # Constant index maps: the conv matrices are DMA'd once and stay resident;
        # single-buffer them so the default double buffering does not waste VMEM.
        const_kwargs = (dict(pipeline_mode=pl.Buffered(1))
                        if single_buffer_consts else {})
        plane_spec = pl.BlockSpec((None, HP, PWP), lambda g: (g, 0, 0))
        twbd_spec = pl.BlockSpec(twbd.shape, lambda g: (0, 0), **const_kwargs)
        tv_spec = pl.BlockSpec(tv.shape, lambda g: (0, 0), **const_kwargs)
        out_spec = pl.BlockSpec((None, 1, PWP), lambda g: (g, 0, 0))
        return pl.pallas_call(
            _make_ssim_kernel(H, HP, W, WP, fuse_vertical, needs_mask),
            out_shape=jax.ShapeDtypeStruct((G, 1, PWP), jnp.float32),
            grid_spec=pltpu.PrefetchScalarGridSpec(
                num_scalar_prefetch=0,
                grid=(G,),
                in_specs=[plane_spec, plane_spec, twbd_spec, tv_spec],
                out_specs=out_spec,
                scratch_shapes=[pltpu.VMEM((5 * HP, PWP), jnp.float32)],
            ),
            compiler_params=pltpu.CompilerParams(
                dimension_semantics=("parallel",),
                vmem_limit_bytes=vmem_limit,
            ),
        )(x1, x2, twbd, tv)

    try:
        partials = run(single_buffer_consts=True)
    except Exception:
        # pipeline_mode=pl.Buffered(1) not supported on this jax/Mosaic build; the
        # default double-buffered constant matrices only cost a little extra VMEM.
        partials = run(single_buffer_consts=False)

    # Final tiny lane reduction + mean over the ORIGINAL (unpadded) pixel count.
    return jnp.sum(partials) / float(N * H * W)


def _ssim_reference(img1, img2):
    """Pure-JAX reference matching the PyTorch module (for validation)."""
    B, C, H, W = img1.shape
    pad = WINDOW_SIZE // 2
    w2d = jnp.asarray(np.outer(G1D, G1D), dtype=jnp.float32)
    w = jnp.broadcast_to(w2d, (C, 1, WINDOW_SIZE, WINDOW_SIZE))

    def conv(x):
        return lax.conv_general_dilated(
            x, w, (1, 1), [(pad, pad), (pad, pad)],
            feature_group_count=C,
            dimension_numbers=("NCHW", "OIHW", "NCHW"),
            precision=lax.Precision.HIGHEST,
        )

    img1 = img1.astype(jnp.float32)
    img2 = img2.astype(jnp.float32)
    mu1 = conv(img1)
    mu2 = conv(img2)
    mu1_sq, mu2_sq, mu1_mu2 = mu1 ** 2, mu2 ** 2, mu1 * mu2
    s1 = conv(img1 * img1) - mu1_sq
    s2 = conv(img2 * img2) - mu2_sq
    s12 = conv(img1 * img2) - mu1_mu2
    ssim_map = ((2 * mu1_mu2 + C1) * (2 * s12 + C2)) / (
        (mu1_sq + mu2_sq + C1) * (s1 + s2 + C2)
    )
    return jnp.mean(ssim_map)


if __name__ == "__main__":
    key = jax.random.PRNGKey(0)
    k1, k2 = jax.random.split(key)
    B, C, H, W = 2, 4, 16, 16
    img1 = jax.random.uniform(k1, (B, C, H, W), dtype=jnp.float32)
    img2 = jax.random.uniform(k2, (B, C, H, W), dtype=jnp.float32)

    out = jax.block_until_ready(ssim_loss(img1, img2))
    ref = jax.block_until_ready(_ssim_reference(img1, img2))

    np.testing.assert_allclose(np.asarray(out), np.asarray(ref), rtol=2e-5, atol=2e-5)
    print("KERNEL_OK")
</pallas_src>

<mosaic_0001>
module attributes {stable_mosaic.version = 11 : i64} {
  func.func @kernel(%arg0: i32, %arg1: memref<1x16x128xf32, #tpu.memory_space<vmem>>, %arg2: memref<1x16x128xf32, #tpu.memory_space<vmem>>, %arg3: memref<128x128xf32, #tpu.memory_space<vmem>>, %arg4: memref<80x80xf32, #tpu.memory_space<vmem>>, %arg5: memref<1x1x128xf32, #tpu.memory_space<vmem>>, %arg6: memref<80x128xf32, #tpu.memory_space<vmem>>) attributes {dimension_semantics = [#tpu.dimension_semantics<parallel>], iteration_bounds = array<i64: 1>, scalar_prefetch = 0 : i64, scratch_operands = 1 : i64, tpu.core_type = #tpu.core_type<tc>, window_params = [{transform_indices = @transform_0, window_bounds = array<i64: 1, 16, 128>}, {transform_indices = @transform_1, window_bounds = array<i64: 1, 16, 128>}, {pipeline_mode = #tpu.pipeline_mode<synchronous>, transform_indices = @transform_2, window_bounds = array<i64: 128, 128>}, {pipeline_mode = #tpu.pipeline_mode<synchronous>, transform_indices = @transform_3, window_bounds = array<i64: 80, 80>}, {transform_indices = @transform_4, window_bounds = array<i64: 1, 1, 128>}]} {
    %c0 = arith.constant 0 : index
    %c0_0 = arith.constant 0 : index
    %c0_1 = arith.constant 0 : index
    %0 = vector.load %arg1[%c0, %c0_0, %c0_1] : memref<1x16x128xf32, #tpu.memory_space<vmem>>, vector<1x16x128xf32>
    %1 = vector.shape_cast %0 : vector<1x16x128xf32> to vector<16x128xf32>
    %c0_2 = arith.constant 0 : index
    %c0_3 = arith.constant 0 : index
    %c0_4 = arith.constant 0 : index
    %2 = vector.load %arg2[%c0_2, %c0_3, %c0_4] : memref<1x16x128xf32, #tpu.memory_space<vmem>>, vector<1x16x128xf32>
    %3 = vector.shape_cast %2 : vector<1x16x128xf32> to vector<16x128xf32>
    %c0_5 = arith.constant 0 : index
    %c0_6 = arith.constant 0 : index
    %4 = vector.load %arg6[%c0_5, %c0_6] : memref<80x128xf32, #tpu.memory_space<vmem>>, vector<16x128xf32>
    tpu.vector_store %arg6[%c0_5, %c0_6], %1 {strides = array<i32>} : memref<80x128xf32, #tpu.memory_space<vmem>>, vector<16x128xf32>,
    %c16 = arith.constant 16 : index
    %c0_7 = arith.constant 0 : index
    %5 = vector.load %arg6[%c16, %c0_7] : memref<80x128xf32, #tpu.memory_space<vmem>>, vector<16x128xf32>
    tpu.vector_store %arg6[%c16, %c0_7], %3 {strides = array<i32>} : memref<80x128xf32, #tpu.memory_space<vmem>>, vector<16x128xf32>,
    %6 = arith.mulf %1, %1 : vector<16x128xf32>
    %c32 = arith.constant 32 : index
    %c0_8 = arith.constant 0 : index
    %7 = vector.load %arg6[%c32, %c0_8] : memref<80x128xf32, #tpu.memory_space<vmem>>, vector<16x128xf32>
    tpu.vector_store %arg6[%c32, %c0_8], %6 {strides = array<i32>} : memref<80x128xf32, #tpu.memory_space<vmem>>, vector<16x128xf32>,
    %8 = arith.mulf %3, %3 : vector<16x128xf32>
    %c48 = arith.constant 48 : index
    %c0_9 = arith.constant 0 : index
    %9 = vector.load %arg6[%c48, %c0_9] : memref<80x128xf32, #tpu.memory_space<vmem>>, vector<16x128xf32>
    tpu.vector_store %arg6[%c48, %c0_9], %8 {strides = array<i32>} : memref<80x128xf32, #tpu.memory_space<vmem>>, vector<16x128xf32>,
    %10 = arith.mulf %1, %3 : vector<16x128xf32>
    %c64 = arith.constant 64 : index
    %c0_10 = arith.constant 0 : index
    %11 = vector.load %arg6[%c64, %c0_10] : memref<80x128xf32, #tpu.memory_space<vmem>>, vector<16x128xf32>
    tpu.vector_store %arg6[%c64, %c0_10], %10 {strides = array<i32>} : memref<80x128xf32, #tpu.memory_space<vmem>>, vector<16x128xf32>,
    %c0_11 = arith.constant 0 : index
    %c0_12 = arith.constant 0 : index
    %12 = vector.load %arg6[%c0_11, %c0_12] : memref<80x128xf32, #tpu.memory_space<vmem>>, vector<80x128xf32>
    %c0_13 = arith.constant 0 : index
    %c0_14 = arith.constant 0 : index
    %13 = vector.load %arg3[%c0_13, %c0_14] : memref<128x128xf32, #tpu.memory_space<vmem>>, vector<128x128xf32>
    %cst = arith.constant dense<0.000000e+00> : vector<80x128xf32>
    %14 = tpu.matmul %12, %13, %cst {dimension_numbers = #tpu.dot_dimension_numbers<[1], [0], [0], [1], [0, 0, 1, 1], [], []>} : vector<80x128xf32>, vector<128x128xf32>, vector<80x128xf32> -> vector<80x128xf32>
    %c0_15 = arith.constant 0 : index
    %c0_16 = arith.constant 0 : index
    %15 = vector.load %arg4[%c0_15, %c0_16] : memref<80x80xf32, #tpu.memory_space<vmem>>, vector<80x80xf32>
    %cst_17 = arith.constant dense<0.000000e+00> : vector<80x128xf32>
    %16 = tpu.matmul %15, %14, %cst_17 {dimension_numbers = #tpu.dot_dimension_numbers<[1], [0], [0], [1], [0, 0, 1, 1], [], []>} : vector<80x80xf32>, vector<80x128xf32>, vector<80x128xf32> -> vector<80x128xf32>
    %17 = vector.extract_strided_slice %16 {offsets = [0, 0], sizes = [16, 128], strides = [1, 1]} : vector<80x128xf32> to vector<16x128xf32>
    %18 = vector.extract_strided_slice %16 {offsets = [16, 0], sizes = [16, 128], strides = [1, 1]} : vector<80x128xf32> to vector<16x128xf32>
    %19 = vector.extract_strided_slice %16 {offsets = [32, 0], sizes = [16, 128], strides = [1, 1]} : vector<80x128xf32> to vector<16x128xf32>
    %20 = vector.extract_strided_slice %16 {offsets = [48, 0], sizes = [16, 128], strides = [1, 1]} : vector<80x128xf32> to vector<16x128xf32>
    %21 = vector.extract_strided_slice %16 {offsets = [64, 0], sizes = [16, 128], strides = [1, 1]} : vector<80x128xf32> to vector<16x128xf32>
    %22 = arith.mulf %17, %17 : vector<16x128xf32>
    %23 = arith.mulf %18, %18 : vector<16x128xf32>
    %24 = arith.mulf %17, %18 : vector<16x128xf32>
    %25 = arith.subf %19, %22 : vector<16x128xf32>
    %26 = arith.subf %20, %23 : vector<16x128xf32>
    %27 = arith.subf %21, %24 : vector<16x128xf32>
    %cst_18 = arith.constant 2.000000e+00 : f32
    %28 = vector.broadcast %cst_18 : f32 to vector<16x128xf32>
    %29 = arith.mulf %28, %24 : vector<16x128xf32>
    %cst_19 = arith.constant 9.99999974E-5 : f32
    %30 = vector.broadcast %cst_19 : f32 to vector<16x128xf32>
    %31 = arith.addf %29, %30 : vector<16x128xf32>
    %cst_20 = arith.constant 2.000000e+00 : f32
    %32 = vector.broadcast %cst_20 : f32 to vector<16x128xf32>
    %33 = arith.mulf %32, %27 : vector<16x128xf32>
    %cst_21 = arith.constant 8.99999984E-4 : f32
    %34 = vector.broadcast %cst_21 : f32 to vector<16x128xf32>
    %35 = arith.addf %33, %34 : vector<16x128xf32>
    %36 = arith.mulf %31, %35 : vector<16x128xf32>
    %37 = arith.addf %22, %23 : vector<16x128xf32>
    %cst_22 = arith.constant 9.99999974E-5 : f32
    %38 = vector.broadcast %cst_22 : f32 to vector<16x128xf32>
    %39 = arith.addf %37, %38 : vector<16x128xf32>
    %40 = arith.addf %25, %26 : vector<16x128xf32>
    %cst_23 = arith.constant 8.99999984E-4 : f32
    %41 = vector.broadcast %cst_23 : f32 to vector<16x128xf32>
    %42 = arith.addf %40, %41 : vector<16x128xf32>
    %43 = arith.mulf %39, %42 : vector<16x128xf32>
    %44 = tpu.reciprocal %43 : vector<16x128xf32> -> vector<16x128xf32>
    %45 = arith.mulf %36, %44 : vector<16x128xf32>
    %cst_24 = arith.constant dense<0.000000e+00> : vector<128xf32>
    %46 = vector.multi_reduction <add>, %45, %cst_24 [0] : vector<16x128xf32> to vector<128xf32>
    %47 = vector.shape_cast %46 : vector<128xf32> to vector<1x128xf32>
    %c0_25 = arith.constant 0 : index
    %c0_26 = arith.constant 0 : index
    %c0_27 = arith.constant 0 : index
    %48 = vector.load %arg5[%c0_25, %c0_26, %c0_27] : memref<1x1x128xf32, #tpu.memory_space<vmem>>, vector<1x1x128xf32>
    %49 = vector.shape_cast %48 : vector<1x1x128xf32> to vector<1x128xf32>
    %50 = vector.shape_cast %47 : vector<1x128xf32> to vector<1x1x128xf32>
    tpu.vector_store %arg5[%c0_25, %c0_26, %c0_27], %50 {strides = array<i32>} : memref<1x1x128xf32, #tpu.memory_space<vmem>>, vector<1x1x128xf32>,
    return
  }
  func.func @transform_0(%arg0: i32) -> (i32, i32, i32) {
    %c0_i32 = arith.constant 0 : i32
    %c0_i32_0 = arith.constant 0 : i32
    %c0_i32_1 = arith.constant 0 : i32
    return %arg0, %c0_i32, %c0_i32_0 : i32, i32, i32
  }
  func.func @transform_1(%arg0: i32) -> (i32, i32, i32) {
    %c0_i32 = arith.constant 0 : i32
    %c0_i32_0 = arith.constant 0 : i32
    %c0_i32_1 = arith.constant 0 : i32
    return %arg0, %c0_i32, %c0_i32_0 : i32, i32, i32
  }
  func.func @transform_2(%arg0: i32) -> (i32, i32) {
    %c0_i32 = arith.constant 0 : i32
    %c0_i32_0 = arith.constant 0 : i32
    %c0_i32_1 = arith.constant 0 : i32
    return %c0_i32, %c0_i32_0 : i32, i32
  }
  func.func @transform_3(%arg0: i32) -> (i32, i32) {
    %c0_i32 = arith.constant 0 : i32
    %c0_i32_0 = arith.constant 0 : i32
    %c0_i32_1 = arith.constant 0 : i32
    return %c0_i32, %c0_i32_0 : i32, i32
  }
  func.func @transform_4(%arg0: i32) -> (i32, i32, i32) {
    %c0_i32 = arith.constant 0 : i32
    %c0_i32_0 = arith.constant 0 : i32
    %c0_i32_1 = arith.constant 0 : i32
    return %arg0, %c0_i32, %c0_i32_0 : i32, i32, i32
  }
}

module attributes {stable_mosaic.version = 11 : i64} {
  func.func @kernel(%arg0: i32, %arg1: memref<1x16x128xf32, #tpu.memory_space<vmem>>, %arg2: memref<1x16x128xf32, #tpu.memory_space<vmem>>, %arg3: memref<128x128xf32, #tpu.memory_space<vmem>>, %arg4: memref<80x80xf32, #tpu.memory_space<vmem>>, %arg5: memref<1x1x128xf32, #tpu.memory_space<vmem>>, %arg6: memref<80x128xf32, #tpu.memory_space<vmem>>) attributes {dimension_semantics = [#tpu.dimension_semantics<parallel>], iteration_bounds = array<i64: 1>, scalar_prefetch = 0 : i64, scratch_operands = 1 : i64, tpu.core_type = #tpu.core_type<tc>, window_params = [{transform_indices = @transform_0, window_bounds = array<i64: 1, 16, 128>}, {transform_indices = @transform_1, window_bounds = array<i64: 1, 16, 128>}, {pipeline_mode = #tpu.pipeline_mode<synchronous>, transform_indices = @transform_2, window_bounds = array<i64: 128, 128>}, {pipeline_mode = #tpu.pipeline_mode<synchronous>, transform_indices = @transform_3, window_bounds = array<i64: 80, 80>}, {transform_indices = @transform_4, window_bounds = array<i64: 1, 1, 128>}]} {
    %c0 = arith.constant 0 : index
    %c0_0 = arith.constant 0 : index
    %c0_1 = arith.constant 0 : index
    %0 = vector.load %arg1[%c0, %c0_0, %c0_1] : memref<1x16x128xf32, #tpu.memory_space<vmem>>, vector<1x16x128xf32>
    %1 = vector.shape_cast %0 : vector<1x16x128xf32> to vector<16x128xf32>
    %c0_2 = arith.constant 0 : index
    %c0_3 = arith.constant 0 : index
    %c0_4 = arith.constant 0 : index
    %2 = vector.load %arg2[%c0_2, %c0_3, %c0_4] : memref<1x16x128xf32, #tpu.memory_space<vmem>>, vector<1x16x128xf32>
    %3 = vector.shape_cast %2 : vector<1x16x128xf32> to vector<16x128xf32>
    %c0_5 = arith.constant 0 : index
    %c0_6 = arith.constant 0 : index
    %4 = vector.load %arg6[%c0_5, %c0_6] : memref<80x128xf32, #tpu.memory_space<vmem>>, vector<16x128xf32>
    tpu.vector_store %arg6[%c0_5, %c0_6], %1 {strides = array<i32>} : memref<80x128xf32, #tpu.memory_space<vmem>>, vector<16x128xf32>,
    %c16 = arith.constant 16 : index
    %c0_7 = arith.constant 0 : index
    %5 = vector.load %arg6[%c16, %c0_7] : memref<80x128xf32, #tpu.memory_space<vmem>>, vector<16x128xf32>
    tpu.vector_store %arg6[%c16, %c0_7], %3 {strides = array<i32>} : memref<80x128xf32, #tpu.memory_space<vmem>>, vector<16x128xf32>,
    %6 = arith.mulf %1, %1 : vector<16x128xf32>
    %c32 = arith.constant 32 : index
    %c0_8 = arith.constant 0 : index
    %7 = vector.load %arg6[%c32, %c0_8] : memref<80x128xf32, #tpu.memory_space<vmem>>, vector<16x128xf32>
    tpu.vector_store %arg6[%c32, %c0_8], %6 {strides = array<i32>} : memref<80x128xf32, #tpu.memory_space<vmem>>, vector<16x128xf32>,
    %8 = arith.mulf %3, %3 : vector<16x128xf32>
    %c48 = arith.constant 48 : index
    %c0_9 = arith.constant 0 : index
    %9 = vector.load %arg6[%c48, %c0_9] : memref<80x128xf32, #tpu.memory_space<vmem>>, vector<16x128xf32>
    tpu.vector_store %arg6[%c48, %c0_9], %8 {strides = array<i32>} : memref<80x128xf32, #tpu.memory_space<vmem>>, vector<16x128xf32>,
    %10 = arith.mulf %1, %3 : vector<16x128xf32>
    %c64 = arith.constant 64 : index
    %c0_10 = arith.constant 0 : index
    %11 = vector.load %arg6[%c64, %c0_10] : memref<80x128xf32, #tpu.memory_space<vmem>>, vector<16x128xf32>
    tpu.vector_store %arg6[%c64, %c0_10], %10 {strides = array<i32>} : memref<80x128xf32, #tpu.memory_space<vmem>>, vector<16x128xf32>,
    %c0_11 = arith.constant 0 : index
    %c0_12 = arith.constant 0 : index
    %12 = vector.load %arg6[%c0_11, %c0_12] : memref<80x128xf32, #tpu.memory_space<vmem>>, vector<80x128xf32>
    %c0_13 = arith.constant 0 : index
    %c0_14 = arith.constant 0 : index
    %13 = vector.load %arg3[%c0_13, %c0_14] : memref<128x128xf32, #tpu.memory_space<vmem>>, vector<128x128xf32>
    %cst = arith.constant dense<0.000000e+00> : vector<80x128xf32>
    %14 = tpu.matmul %12, %13, %cst {dimension_numbers = #tpu.dot_dimension_numbers<[1], [0], [0], [1], [0, 0, 1, 1], [], []>} : vector<80x128xf32>, vector<128x128xf32>, vector<80x128xf32> -> vector<80x128xf32>
    %c0_15 = arith.constant 0 : index
    %c0_16 = arith.constant 0 : index
    %15 = vector.load %arg4[%c0_15, %c0_16] : memref<80x80xf32, #tpu.memory_space<vmem>>, vector<80x80xf32>
    %cst_17 = arith.constant dense<0.000000e+00> : vector<80x128xf32>
    %16 = tpu.matmul %15, %14, %cst_17 {dimension_numbers = #tpu.dot_dimension_numbers<[1], [0], [0], [1], [0, 0, 1, 1], [], []>} : vector<80x80xf32>, vector<80x128xf32>, vector<80x128xf32> -> vector<80x128xf32>
    %17 = vector.extract_strided_slice %16 {offsets = [0, 0], sizes = [16, 128], strides = [1, 1]} : vector<80x128xf32> to vector<16x128xf32>
    %18 = vector.extract_strided_slice %16 {offsets = [16, 0], sizes = [16, 128], strides = [1, 1]} : vector<80x128xf32> to vector<16x128xf32>
    %19 = vector.extract_strided_slice %16 {offsets = [32, 0], sizes = [16, 128], strides = [1, 1]} : vector<80x128xf32> to vector<16x128xf32>
    %20 = vector.extract_strided_slice %16 {offsets = [48, 0], sizes = [16, 128], strides = [1, 1]} : vector<80x128xf32> to vector<16x128xf32>
    %21 = vector.extract_strided_slice %16 {offsets = [64, 0], sizes = [16, 128], strides = [1, 1]} : vector<80x128xf32> to vector<16x128xf32>
    %22 = arith.mulf %17, %17 : vector<16x128xf32>
    %23 = arith.mulf %18, %18 : vector<16x128xf32>
    %24 = arith.mulf %17, %18 : vector<16x128xf32>
    %25 = arith.subf %19, %22 : vector<16x128xf32>
    %26 = arith.subf %20, %23 : vector<16x128xf32>
    %27 = arith.subf %21, %24 : vector<16x128xf32>
    %cst_18 = arith.constant 2.000000e+00 : f32
    %28 = vector.broadcast %cst_18 : f32 to vector<16x128xf32>
    %29 = arith.mulf %28, %24 : vector<16x128xf32>
    %cst_19 = arith.constant 9.99999974E-5 : f32
    %30 = vector.broadcast %cst_19 : f32 to vector<16x128xf32>
    %31 = arith.addf %29, %30 : vector<16x128xf32>
    %cst_20 = arith.constant 2.000000e+00 : f32
    %32 = vector.broadcast %cst_20 : f32 to vector<16x128xf32>
    %33 = arith.mulf %32, %27 : vector<16x128xf32>
    %cst_21 = arith.constant 8.99999984E-4 : f32
    %34 = vector.broadcast %cst_21 : f32 to vector<16x128xf32>
    %35 = arith.addf %33, %34 : vector<16x128xf32>
    %36 = arith.mulf %31, %35 : vector<16x128xf32>
    %37 = arith.addf %22, %23 : vector<16x128xf32>
    %cst_22 = arith.constant 9.99999974E-5 : f32
    %38 = vector.broadcast %cst_22 : f32 to vector<16x128xf32>
    %39 = arith.addf %37, %38 : vector<16x128xf32>
    %40 = arith.addf %25, %26 : vector<16x128xf32>
    %cst_23 = arith.constant 8.99999984E-4 : f32
    %41 = vector.broadcast %cst_23 : f32 to vector<16x128xf32>
    %42 = arith.addf %40, %41 : vector<16x128xf32>
    %43 = arith.mulf %39, %42 : vector<16x128xf32>
    %44 = tpu.reciprocal %43 : vector<16x128xf32> -> vector<16x128xf32>
    %45 = arith.mulf %36, %44 : vector<16x128xf32>
    %cst_24 = arith.constant dense<0.000000e+00> : vector<128xf32>
    %46 = vector.multi_reduction <add>, %45, %cst_24 [0] : vector<16x128xf32> to vector<128xf32>
    %47 = vector.shape_cast %46 : vector<128xf32> to vector<1x128xf32>
    %c0_25 = arith.constant 0 : index
    %c0_26 = arith.constant 0 : index
    %c0_27 = arith.constant 0 : index
    %48 = vector.load %arg5[%c0_25, %c0_26, %c0_27] : memref<1x1x128xf32, #tpu.memory_space<vmem>>, vector<1x1x128xf32>
    %49 = vector.shape_cast %48 : vector<1x1x128xf32> to vector<1x128xf32>
    %50 = vector.shape_cast %47 : vector<1x128xf32> to vector<1x1x128xf32>
    tpu.vector_store %arg5[%c0_25, %c0_26, %c0_27], %50 {strides = array<i32>} : memref<1x1x128xf32, #tpu.memory_space<vmem>>, vector<1x1x128xf32>,
    return
  }
  func.func @transform_0(%arg0: i32) -> (i32, i32, i32) {
    %c0_i32 = arith.constant 0 : i32
    %c0_i32_0 = arith.constant 0 : i32
    %c0_i32_1 = arith.constant 0 : i32
    return %arg0, %c0_i32, %c0_i32_0 : i32, i32, i32
  }
  func.func @transform_1(%arg0: i32) -> (i32, i32, i32) {
    %c0_i32 = arith.constant 0 : i32
    %c0_i32_0 = arith.constant 0 : i32
    %c0_i32_1 = arith.constant 0 : i32
    return %arg0, %c0_i32, %c0_i32_0 : i32, i32, i32
  }
  func.func @transform_2(%arg0: i32) -> (i32, i32) {
    %c0_i32 = arith.constant 0 : i32
    %c0_i32_0 = arith.constant 0 : i32
    %c0_i32_1 = arith.constant 0 : i32
    return %c0_i32, %c0_i32_0 : i32, i32
  }
  func.func @transform_3(%arg0: i32) -> (i32, i32) {
    %c0_i32 = arith.constant 0 : i32
    %c0_i32_0 = arith.constant 0 : i32
    %c0_i32_1 = arith.constant 0 : i32
    return %c0_i32, %c0_i32_0 : i32, i32
  }
  func.func @transform_4(%arg0: i32) -> (i32, i32, i32) {
    %c0_i32 = arith.constant 0 : i32
    %c0_i32_0 = arith.constant 0 : i32
    %c0_i32_1 = arith.constant 0 : i32
    return %arg0, %c0_i32, %c0_i32_0 : i32, i32, i32
  }
}

</mosaic_0001>

<bundles_post_ra>
// kernel: tpu_custom_call.1
= control target key start
LH: loop header
LB: loop body
LE: loop exit
PB: predicated region body
PF: predicated region fallthrough
CT: control target
= control target key end

     0   :  { %9 = vsyncpa [#allocation4], 0  ;;  %s898_s0 = inlined_call_operand.hbm [shape: f32[1,16,128], index: 0, kind: input, shape index: {}]   ;;  %s899_s1 = inlined_call_operand.hbm [shape: f32[1,16,128], index: 1, kind: input, shape index: {}]   ;;  %s900_s2 = inlined_call_operand.hbm [shape: f32[128,128], index: 2, kind: input, shape index: {}]   ;;  %s901_s3 = inlined_call_operand.hbm [shape: f32[80,80], index: 3, kind: input, shape index: {}]   ;;  %s902_s4 = inlined_call_operand.hbm [shape: f32[1,1,128], index: 4, kind: output, shape index: {}]  }
   0x1   :  { %10 = vsyncpa [#allocation7], 0 }
   0x2   :  { %11 = vsyncpa [#allocation10], 0 }
   0x3   :  { %12 = vsyncpa [#allocation5], 0  ;;  %s770_s15 = smov [#allocation6]   ;;  %s771_s17 = smov [#allocation3]  }
   0x4   :  { %s30_s16 = sshll.u32 %s770_s15, 4  ;;  %s18_s18 = sshll.u32 %s771_s17, 4  ;;  %s31_s16 = int_to_ptr.vmem [resolvable:$true] %s30_s16  ;;  %s802_s18 = int_to_ptr.vmem [resolvable:$true] %s18_s18 }
   0x5   :  { %s652_s21 = scalar_lea.hbm %s899_s1, 256 }
   0x6   :  { %p653_p0 = scmp.ne.s32.totalorder %s899_s1, %s652_s21  ;;  %p656_p1 = scmp.lt.u32.totalorder %s652_s21, %s899_s1 }
   0x8   :  { %p658_p2 = pnand %p656_p1, %p653_p0 }
   0xa   :  { %661 = shalt.err (!%p658_p2)
}
   0xb   :  { %s662_s26 = scalar_lea.vmem %s31_s16, 256  ;;  %p667_p4 = scmp.lt.s32.totalorder %s31_s16, %s31_s16 }
   0xc   :  { %p663_p3 = scmp.ne.s32.totalorder %s31_s16, %s662_s26  ;;  %p668_p5 = scmp.lt.s32.totalorder %s662_s26, %s662_s26 }
   0xe   :  { %p669_p6 = por %p668_p5, %p667_p4 }
  0x10   :  { %p670_p7 = pnand %p669_p6, %p663_p3 }
  0x12   :  { %673 = shalt.err (!%p670_p7)
}
  0x13   :  { %s772_s27 = smov 128   ;;  %s773_s28 = smov 8  }
  0x14   :  { %36 = dma.hbm_to_vmem [thread:$0]  %s899_s1, 256, %s31_s16, [#allocation7], %s772_s27, %s772_s27, %s773_s28  }
  0x15   :  { %s674_s7 = scalar_lea.hbm %s898_s0, 256 }
  0x16   :  { %p675_p8 = scmp.ne.s32.totalorder %s898_s0, %s674_s7  ;;  %p678_p9 = scmp.lt.u32.totalorder %s674_s7, %s898_s0 }
  0x18   :  { %p680_p10 = pnand %p678_p9, %p675_p8 }
  0x1a   :  { %683 = shalt.err (!%p680_p10)
}
  0x1b   :  { %s684_s12 = scalar_lea.vmem %s802_s18, 256  ;;  %p689_p12 = scmp.lt.s32.totalorder %s802_s18, %s802_s18 }
  0x1c   :  { %p685_p11 = scmp.ne.s32.totalorder %s802_s18, %s684_s12  ;;  %p690_p13 = scmp.lt.s32.totalorder %s684_s12, %s684_s12 }
  0x1e   :  { %p691_p0 = por %p690_p13, %p689_p12 }
  0x20   :  { %p692_p1 = pnand %p691_p0, %p685_p11 }
  0x22   :  { %695 = shalt.err (!%p692_p1)
}
  0x23   :  { %24 = dma.hbm_to_vmem [thread:$0]  %s898_s0, 256, %s802_s18, [#allocation4], %s772_s27, %s772_s27, %s773_s28  }
  0x24   :  { %s774_s14 = smov [#allocation8]   ;;  %s775_s16 = smov [#allocation9]  }
  0x25   :  { %s42_s15 = sshll.u32 %s774_s14, 4  ;;  %s54_s17 = sshll.u32 %s775_s16, 4  ;;  %s43_s15 = int_to_ptr.vmem [resolvable:$true] %s42_s15  ;;  %s839_s17 = int_to_ptr.vmem [resolvable:$true] %s54_s17 }
  0x26   :  { %s696_s21 = scalar_lea.hbm %s900_s2, 2048 }
  0x27   :  { %p697_p2 = scmp.ne.s32.totalorder %s900_s2, %s696_s21  ;;  %p700_p3 = scmp.lt.u32.totalorder %s696_s21, %s900_s2 }
  0x29   :  { %p702_p4 = pnand %p700_p3, %p697_p2 }
  0x2b   :  { %705 = shalt.err (!%p702_p4)
}
  0x2c   :  { %s706_s0 = scalar_lea.vmem %s43_s15, 2048  ;;  %p711_p6 = scmp.lt.s32.totalorder %s43_s15, %s43_s15 }
  0x2d   :  { %p707_p5 = scmp.ne.s32.totalorder %s43_s15, %s706_s0  ;;  %p712_p7 = scmp.lt.s32.totalorder %s706_s0, %s706_s0 }
  0x2f   :  { %p713_p8 = por %p712_p7, %p711_p6 }
  0x31   :  { %p714_p9 = pnand %p713_p8, %p707_p5 }
  0x33   :  { %717 = shalt.err (!%p714_p9)
}
  0x34   :  { %48 = dma.hbm_to_vmem [thread:$0]  %s900_s2, 2048, %s43_s15, [#allocation7], %s772_s27, %s772_s27, %s773_s28  }
  0x35   :  { %s718_s5 = scalar_lea.hbm %s901_s3, 1280 }
  0x36   :  { %p719_p10 = scmp.ne.s32.totalorder %s901_s3, %s718_s5  ;;  %p722_p11 = scmp.lt.u32.totalorder %s718_s5, %s901_s3 }
  0x38   :  { %p724_p12 = pnand %p722_p11, %p719_p10 }
  0x3a   :  { %727 = shalt.err (!%p724_p12)
}
  0x3b   :  { %s728_s10 = scalar_lea.vmem %s839_s17, 1280  ;;  %p733_p0 = scmp.lt.s32.totalorder %s839_s17, %s839_s17 }
  0x3c   :  { %p729_p13 = scmp.ne.s32.totalorder %s839_s17, %s728_s10  ;;  %p734_p1 = scmp.lt.s32.totalorder %s728_s10, %s728_s10 }
  0x3e   :  { %p735_p2 = por %p734_p1, %p733_p0 }
  0x40   :  { %p736_p3 = pnand %p735_p2, %p729_p13 }
  0x42   :  { %739 = shalt.err (!%p736_p3)
}
  0x43   :  { %60 = dma.hbm_to_vmem [thread:$0]  %s901_s3, 1280, %s839_s17, [#allocation10], %s772_s27, %s772_s27, %s773_s28  }
  0x44   :  { %762 = dma.done.wait [#allocation4], 256  }
  0x45   :  { %763 = vsyncadd [#allocation4], 4294967040 }
  0x46   :  { %764 = dma.done.wait [#allocation7], 2304  }
  0x47   :  { %765 = vsyncadd [#allocation7], 4294964992 }
  0x48   :  { %766 = dma.done.wait [#allocation10], 1280  }
  0x49   :  { %767 = vsyncadd [#allocation10], 4294966016  ;;  %v103_v0 = vld [vmem:[#allocation8] sm:$0xff]  ;;  %v104_v1 = vld [vmem:[#allocation8 + $0x8] sm:$0xff]  ;;  %vm244_vm0 = vcmask 654336   ;;  %s776_s3 = smov [#allocation11]  }
  0x4a   :  { %v105_v2 = vld [vmem:[#allocation8 + $0x10] sm:$0xff]  ;;  %v589_v3 = vpack.c.bf16 %v104_v1, %v103_v0  ;;  %v106_v4 = vld [vmem:[#allocation8 + $0x18] sm:$0xff]  ;;  %v107_v6 = vld [vmem:[#allocation8 + $0x20] sm:$0xff]  ;;  %s440_s27 = sshll.u32 %s776_s3, 4  ;;  %s441_s27 = int_to_ptr.vmem [resolvable:$true] %s440_s27 }
  0x4b   :  { %v593_v5 = vpack.c.bf16 %v106_v4, %v105_v2  ;;  %v108_v7 = vld [vmem:[#allocation8 + $0x28] sm:$0xff]  ;;  %v73_v9 = vld [vmem:[#allocation3] sm:$0xff]  ;;  %v109_v10 = vld [vmem:[#allocation8 + $0x30] sm:$0xff]  ;;  %s740_s28 = scalar_lea.vmem %s441_s27, 16  ;;  %s744_s12 = scalar_lea.vmem %s441_s27, 32 }
  0x4c   :  { %590 = vmatprep.subr.bf16.mxu0 %v589_v3  ;;  %v597_v8 = vpack.c.bf16 %v108_v7, %v107_v6  ;;  %v110_v11 = vld [vmem:[#allocation8 + $0x38] sm:$0xff]  ;;  %539 = vmatprep.mubr.f32.mxu0 %v73_v9  ;;  %v111_v13 = vld [vmem:[#allocation8 + $0x40] sm:$0xff]  ;;  %v112_v14 = vld [vmem:[#allocation8 + $0x48] sm:$0xff]  ;;  %v81_v28 = vmul.f32 %v73_v9, %v73_v9  ;;  %p741_p4 = scmp.ne.s32.totalorder %s441_s27, %s740_s28  ;;  %p745_p5 = scmp.lt.s32.totalorder %s441_s27, %s441_s27 }
  0x4d   :  { %592 = vmatpush3.bf16.msra.mxu0 %v589_v3  ;;  %v601_v12 = vpack.c.bf16 %v110_v11, %v109_v10  ;;  %v605_v15 = vpack.c.bf16 %v112_v14, %v111_v13  ;;  %v113_v16 = vld [vmem:[#allocation8 + $0x50] sm:$0xff]  ;;  %v114_v17 = vld [vmem:[#allocation8 + $0x58] sm:$0xff]  ;;  %v115_v19 = vld [vmem:[#allocation8 + $0x60] sm:$0xff]  ;;  %p746_p6 = scmp.lt.s32.totalorder %s744_s12, %s740_s28 }
  0x4e   :  { %594 = vmatprep.subr.bf16.mxu0 %v593_v5  ;;  %v609_v18 = vpack.c.bf16 %v114_v17, %v113_v16  ;;  %v116_v20 = vld [vmem:[#allocation8 + $0x68] sm:$0xff]  ;;  %v117_v22 = vld [vmem:[#allocation8 + $0x70] sm:$0xff]  ;;  %v118_v23 = vld [vmem:[#allocation8 + $0x78] sm:$0xff] }
  0x4f   :  { %v613_v21 = vpack.c.bf16 %v116_v20, %v115_v19  ;;  %v617_v24 = vpack.c.bf16 %v118_v23, %v117_v22  ;;  %v74_v25 = vld [vmem:[#allocation3 + $0x8] sm:$0xff]  ;;  %v75_v26 = vld [vmem:[#allocation6] sm:$0xff]  ;;  %v76_v27 = vld [vmem:[#allocation6 + $0x8] sm:$0xff]  ;;  %p747_p7 = por %p746_p6, %p745_p5 }
  0x50   :  { %v82_v29 = vmul.f32 %v74_v25, %v74_v25  ;;  %v85_v30 = vmul.f32 %v75_v26, %v75_v26  ;;  %v86_v31 = vmul.f32 %v76_v27, %v76_v27  ;;  %v89_v32 = vmul.f32 %v75_v26, %v73_v9  ;;  %v234_v34 = vld [vmem:[#allocation9] sm:$0xff]  ;;  %v235_v50 = vld [vmem:[#allocation9 + $0x8] sm:$0xff]  ;;  %v236_v51 = vld [vmem:[#allocation9 + $0x10] sm:$0xff] }
  0x51   :  { %596 = vmatpush3.bf16.msra.mxu0 %v593_v5  ;;  %v90_v33 = vmul.f32 %v76_v27, %v74_v25  ;;  %574 = vmatprep.mubr.msk.f32.mxu1 %vm244_vm0, %v234_v34  ;;  %v237_v52 = vld [vmem:[#allocation9 + $0x18] sm:$0xff]  ;;  %v238_v53 = vld [vmem:[#allocation9 + $0x20] sm:$0xff]  ;;  %v239_v54 = vld [vmem:[#allocation9 + $0x28] sm:$0xff]  ;;  %p748_p8 = pnand %p747_p7, %p741_p4 }
  0x52   :  { %598 = vmatprep.subr.bf16.mxu0 %v597_v8  ;;  %v240_v55 = vld [vmem:[#allocation9 + $0x30] sm:$0xff]  ;;  %v241_v56 = vld [vmem:[#allocation9 + $0x38] sm:$0xff]  ;;  %v242_v57 = vld [vmem:[#allocation9 + $0x40] sm:$0xff] }
  0x53   :  { %v243_v58 = vld [vmem:[#allocation9 + $0x48] sm:$0xff] }
  0x55   :  { %600 = vmatpush3.bf16.msra.mxu0 %v597_v8 }
  0x56   :  { %602 = vmatprep.subr.bf16.mxu0 %v601_v12 }
  0x59   :  { %604 = vmatpush3.bf16.msra.mxu0 %v601_v12 }
  0x5a   :  { %606 = vmatprep.subr.bf16.mxu0 %v605_v15 }
  0x5d   :  { %608 = vmatpush3.bf16.msra.mxu0 %v605_v15 }
  0x5e   :  { %610 = vmatprep.subr.bf16.mxu0 %v609_v18 }
  0x61   :  { %612 = vmatpush3.bf16.msra.mxu0 %v609_v18 }
  0x62   :  { %614 = vmatprep.subr.bf16.mxu0 %v613_v21 }
  0x65   :  { %616 = vmatpush3.bf16.msra.mxu0 %v613_v21 }
  0x66   :  { %618 = vmatprep.subr.bf16.mxu0 %v617_v24 }
  0x69   :  { %620 = vmatpush3.bf16.msra.mxu0 %v617_v24 }
  0x6c   :  { %540 = vmatmul.mubr.f32.vlgmr.msra.gmra.mrb[0].mxu0 %v74_v25 }
  0x6d   :  { %542 = vmatprep.mubr.f32.mxu0 %v75_v26 }
  0x70   :  { %543 = vmatmul.mubr.f32.gmra.mrb[2].mxu0 %v76_v27 }
  0x71   :  { %545 = vmatprep.mubr.f32.mxu0 %v81_v28 }
  0x74   :  { %546 = vmatmul.mubr.f32.gmra.mrb[4].mxu0 %v82_v29 }
  0x75   :  { %548 = vmatprep.mubr.f32.mxu0 %v85_v30 }
  0x78   :  { %549 = vmatmul.mubr.f32.gmra.mrb[6].mxu0 %v86_v31 }
  0x79   :  { %551 = vmatprep.mubr.f32.mxu0 %v89_v32 }
  0x7c   :  { %552 = vmatmul.mubr.f32.gmra.mrb[8].mxu0 %v90_v33 }
 0x13f   :  { %v541_v35 = vpop.f32.mrb[0].mxu0 }
 0x140   :  { %v185_v36 = vpop.f32.mrb[1].mxu0 }
 0x141   :  { %v621_v37 = vpack.c.bf16 %v541_v35, %v185_v36 }
 0x143   :  { %v544_v38 = vpop.f32.mrb[2].mxu0  ;;  %622 = vmatprep.subr.bf16.mxu1 %v621_v37 }
 0x144   :  { %v195_v39 = vpop.f32.mrb[3].mxu0  ;;  %624 = vmatpush3.bf16.msra.mxu1 %v621_v37 }
 0x145   :  { %v625_v40 = vpack.c.bf16 %v544_v38, %v195_v39 }
 0x147   :  { %v547_v41 = vpop.f32.mrb[4].mxu0  ;;  %626 = vmatprep.subr.bf16.mxu1 %v625_v40 }
 0x148   :  { %v205_v42 = vpop.f32.mrb[5].mxu0  ;;  %628 = vmatpush3.bf16.msra.mxu1 %v625_v40 }
 0x149   :  { %v629_v43 = vpack.c.bf16 %v547_v41, %v205_v42 }
 0x14b   :  { %v550_v44 = vpop.f32.mrb[6].mxu0  ;;  %630 = vmatprep.subr.bf16.mxu1 %v629_v43 }
 0x14c   :  { %v215_v45 = vpop.f32.mrb[7].mxu0  ;;  %632 = vmatpush3.bf16.msra.mxu1 %v629_v43 }
 0x14d   :  { %v633_v46 = vpack.c.bf16 %v550_v44, %v215_v45 }
 0x14f   :  { %v553_v47 = vpop.f32.mrb[8].mxu0  ;;  %634 = vmatprep.subr.bf16.mxu1 %v633_v46 }
 0x150   :  { %v225_v48 = vpop.f32.mrb[9].mxu0  ;;  %636 = vmatpush3.bf16.msra.mxu1 %v633_v46 }
 0x151   :  { %v637_v49 = vpack.c.bf16 %v553_v47, %v225_v48 }
 0x153   :  { %638 = vmatprep.subr.bf16.mxu1 %v637_v49 }
 0x154   :  { %640 = vmatpush3.bf16.msra.mxu1 %v637_v49 }
 0x157   :  { %575 = vmatmul.mubr.msk.f32.vlgmr.msra.gmra.mrb[0].mxu1 %vm244_vm0, %v235_v50 }
 0x158   :  { %577 = vmatprep.mubr.msk.f32.mxu1 %vm244_vm0, %v236_v51 }
 0x15b   :  { %578 = vmatmul.mubr.msk.f32.gmra.mrb[2].mxu1 %vm244_vm0, %v237_v52 }
 0x15c   :  { %580 = vmatprep.mubr.msk.f32.mxu1 %vm244_vm0, %v238_v53 }
 0x15f   :  { %581 = vmatmul.mubr.msk.f32.gmra.mrb[4].mxu1 %vm244_vm0, %v239_v54 }
 0x160   :  { %583 = vmatprep.mubr.msk.f32.mxu1 %vm244_vm0, %v240_v55 }
 0x163   :  { %584 = vmatmul.mubr.msk.f32.gmra.mrb[6].mxu1 %vm244_vm0, %v241_v56 }
 0x164   :  { %586 = vmatprep.mubr.msk.f32.mxu1 %vm244_vm0, %v242_v57 }
 0x167   :  { %587 = vmatmul.mubr.msk.f32.gmra.mrb[8].mxu1 %vm244_vm0, %v243_v58 }
 0x22a   :  { %v576_v59 = vpop.f32.mrb[0].mxu1 }
 0x22b   :  { %v341_v60 = vpop.f32.mrb[1].mxu1  ;;  %v391_v62 = vmul.f32 %v576_v59, %v576_v59 }
 0x22c   :  { %v390_v2 = vmul.f32 %v341_v60, %v341_v60 }
 0x22e   :  { %v579_v61 = vpop.f32.mrb[2].mxu1 }
 0x22f   :  { %v393_v63 = vmul.f32 %v579_v61, %v579_v61  ;;  %v395_v0 = vmul.f32 %v579_v61, %v576_v59  ;;  %v351_v1 = vpop.f32.mrb[3].mxu1 }
 0x230   :  { %v392_v3 = vmul.f32 %v351_v1, %v351_v1  ;;  %v394_v4 = vmul.f32 %v351_v1, %v341_v60 }
 0x231   :  { %v413_v5 = vadd.f32 %v393_v63, %v391_v62  ;;  %v403_v18 = vmul.f32 2.0, %v395_v0 }
 0x232   :  { %v412_v6 = vadd.f32 %v392_v3, %v390_v2  ;;  %v582_v7 = vpop.f32.mrb[4].mxu1  ;;  %v402_v23 = vmul.f32 2.0, %v394_v4 }
 0x233   :  { %v397_v8 = vsub.f32 %v582_v7, %v391_v62  ;;  %v361_v9 = vpop.f32.mrb[5].mxu1  ;;  %v415_v19 = vadd.f32 0.0001, %v413_v5  ;;  %v405_v31 = vadd.f32 0.0001, %v403_v18 }
 0x234   :  { %v396_v10 = vsub.f32 %v361_v9, %v390_v2  ;;  %v414_v24 = vadd.f32 0.0001, %v412_v6  ;;  %v404_v33 = vadd.f32 0.0001, %v402_v23 }
 0x236   :  { %v585_v11 = vpop.f32.mrb[6].mxu1 }
 0x237   :  { %v399_v12 = vsub.f32 %v585_v11, %v393_v63  ;;  %v371_v13 = vpop.f32.mrb[7].mxu1 }
 0x238   :  { %v398_v14 = vsub.f32 %v371_v13, %v392_v3 }
 0x239   :  { %v417_v15 = vadd.f32 %v399_v12, %v397_v8 }
 0x23a   :  { %v416_v16 = vadd.f32 %v398_v14, %v396_v10  ;;  %v588_v17 = vpop.f32.mrb[8].mxu1 }
 0x23b   :  { %v419_v20 = vadd.f32 0.0009, %v417_v15  ;;  %v401_v21 = vsub.f32 %v588_v17, %v395_v0  ;;  %v381_v22 = vpop.f32.mrb[9].mxu1 }
 0x23c   :  { %v418_v25 = vadd.f32 0.0009, %v416_v16  ;;  %v400_v26 = vsub.f32 %v381_v22, %v394_v4 }
 0x23d   :  { %v421_v27 = vmul.f32 %v419_v20, %v415_v19  ;;  %v407_v28 = vmul.f32 2.0, %v401_v21 }
 0x23e   :  { %v420_v29 = vmul.f32 %v418_v25, %v414_v24  ;;  %v406_v30 = vmul.f32 2.0, %v400_v26 }
 0x23f   :  { %648 = vrcp.f32 %v421_v27  ;;  %v409_v32 = vadd.f32 0.0009, %v407_v28 }
 0x240   :  { %650 = vrcp.f32 %v420_v29  ;;  %v408_v34 = vadd.f32 0.0009, %v406_v30 }
 0x241   :  { %v411_v35 = vmul.f32 %v409_v32, %v405_v31 }
 0x242   :  { %v410_v36 = vmul.f32 %v408_v34, %v404_v33 }
 0x249   :  { %v649_v37 = vpop.eup %648 }
 0x24a   :  { %v651_v38 = vpop.eup %650  ;;  %v425_v39 = vmul.f32 %v649_v37, %v411_v35 }
 0x24b   :  { %v424_v40 = vmul.f32 %v651_v38, %v410_v36 }
 0x24d   :  { %v426_v41 = vadd.f32 %v425_v39, %v424_v40 }
 0x24f   :  { %v427_v42 = vrot.slane %v426_v41, 4 }
 0x251   :  { %v428_v43 = vadd.f32 %v427_v42, %v426_v41 }
 0x253   :  { %v429_v44 = vrot.slane %v428_v43, 2 }
 0x255   :  { %v430_v45 = vadd.f32 %v429_v44, %v428_v43 }
 0x257   :  { %v431_v46 = vrot.slane %v430_v45, 1 }
 0x259   :  { %v432_v47 = vadd.f32 %v431_v46, %v430_v45 }
 0x25b   :  { %433 = vst [vmem:[#allocation11] sm:$0x1] %v432_v47 }
 0x25c   :  { %751 = shalt.err (!%p748_p8)
}
 0x25d   :  { %s752_s14 = scalar_lea.hbm %s902_s4, 16 }
 0x25e   :  { %p753_p9 = scmp.ne.s32.totalorder %s902_s4, %s752_s14  ;;  %p756_p10 = scmp.lt.u32.totalorder %s752_s14, %s902_s4 }
 0x260   :  { %p758_p11 = pnand %p756_p10, %p753_p9 }
 0x262   :  { %761 = shalt.err (!%p758_p11)
}
 0x263   :  { %443 = dma.vmem_to_hbm [thread:$0]  %s441_s27, 16, %s902_s4, [#allocation5]  }
 0x264   :  { %768 = dma.done.wait [#allocation5], 16  }
 0x265   :  { %769 = vsyncadd [#allocation5], 4294967280 }
 0x266   :  { %447 = vsyncpa [#allocation4], 1 }
 0x267   :  { %448 = vsyncpa [#allocation7], 1 }
 0x268   :  { %449 = vsyncpa [#allocation10], 1 }
 0x269   :  { %450 = vsyncpa [#allocation5], 1 }

// kernel: tpu_custom_call.1
= control target key start
LH: loop header
LB: loop body
LE: loop exit
PB: predicated region body
PF: predicated region fallthrough
CT: control target
= control target key end

     0   :  { %9 = vsyncpa [#allocation4], 0  ;;  %s898_s0 = inlined_call_operand.hbm [shape: f32[1,16,128], index: 0, kind: input, shape index: {}]   ;;  %s899_s1 = inlined_call_operand.hbm [shape: f32[1,16,128], index: 1, kind: input, shape index: {}]   ;;  %s900_s2 = inlined_call_operand.hbm [shape: f32[128,128], index: 2, kind: input, shape index: {}]   ;;  %s901_s3 = inlined_call_operand.hbm [shape: f32[80,80], index: 3, kind: input, shape index: {}]   ;;  %s902_s4 = inlined_call_operand.hbm [shape: f32[1,1,128], index: 4, kind: output, shape index: {}]  }
   0x1   :  { %10 = vsyncpa [#allocation7], 0 }
   0x2   :  { %11 = vsyncpa [#allocation10], 0 }
   0x3   :  { %12 = vsyncpa [#allocation5], 0  ;;  %s770_s15 = smov [#allocation6]   ;;  %s771_s17 = smov [#allocation3]  }
   0x4   :  { %s30_s16 = sshll.u32 %s770_s15, 4  ;;  %s18_s18 = sshll.u32 %s771_s17, 4  ;;  %s31_s16 = int_to_ptr.vmem [resolvable:$true] %s30_s16  ;;  %s802_s18 = int_to_ptr.vmem [resolvable:$true] %s18_s18 }
   0x5   :  { %s652_s21 = scalar_lea.hbm %s899_s1, 256 }
   0x6   :  { %p653_p0 = scmp.ne.s32.totalorder %s899_s1, %s652_s21  ;;  %p656_p1 = scmp.lt.u32.totalorder %s652_s21, %s899_s1 }
   0x8   :  { %p658_p2 = pnand %p656_p1, %p653_p0 }
   0xa   :  { %661 = shalt.err (!%p658_p2)
}
   0xb   :  { %s662_s26 = scalar_lea.vmem %s31_s16, 256  ;;  %p667_p4 = scmp.lt.s32.totalorder %s31_s16, %s31_s16 }
   0xc   :  { %p663_p3 = scmp.ne.s32.totalorder %s31_s16, %s662_s26  ;;  %p668_p5 = scmp.lt.s32.totalorder %s662_s26, %s662_s26 }
   0xe   :  { %p669_p6 = por %p668_p5, %p667_p4 }
  0x10   :  { %p670_p7 = pnand %p669_p6, %p663_p3 }
  0x12   :  { %673 = shalt.err (!%p670_p7)
}
  0x13   :  { %s772_s27 = smov 128   ;;  %s773_s28 = smov 8  }
  0x14   :  { %36 = dma.hbm_to_vmem [thread:$0]  %s899_s1, 256, %s31_s16, [#allocation7], %s772_s27, %s772_s27, %s773_s28  }
  0x15   :  { %s674_s7 = scalar_lea.hbm %s898_s0, 256 }
  0x16   :  { %p675_p8 = scmp.ne.s32.totalorder %s898_s0, %s674_s7  ;;  %p678_p9 = scmp.lt.u32.totalorder %s674_s7, %s898_s0 }
  0x18   :  { %p680_p10 = pnand %p678_p9, %p675_p8 }
  0x1a   :  { %683 = shalt.err (!%p680_p10)
}
  0x1b   :  { %s684_s12 = scalar_lea.vmem %s802_s18, 256  ;;  %p689_p12 = scmp.lt.s32.totalorder %s802_s18, %s802_s18 }
  0x1c   :  { %p685_p11 = scmp.ne.s32.totalorder %s802_s18, %s684_s12  ;;  %p690_p13 = scmp.lt.s32.totalorder %s684_s12, %s684_s12 }
  0x1e   :  { %p691_p0 = por %p690_p13, %p689_p12 }
  0x20   :  { %p692_p1 = pnand %p691_p0, %p685_p11 }
  0x22   :  { %695 = shalt.err (!%p692_p1)
}
  0x23   :  { %24 = dma.hbm_to_vmem [thread:$0]  %s898_s0, 256, %s802_s18, [#allocation4], %s772_s27, %s772_s27, %s773_s28  }
  0x24   :  { %s774_s14 = smov [#allocation8]   ;;  %s775_s16 = smov [#allocation9]  }
  0x25   :  { %s42_s15 = sshll.u32 %s774_s14, 4  ;;  %s54_s17 = sshll.u32 %s775_s16, 4  ;;  %s43_s15 = int_to_ptr.vmem [resolvable:$true] %s42_s15  ;;  %s839_s17 = int_to_ptr.vmem [resolvable:$true] %s54_s17 }
  0x26   :  { %s696_s21 = scalar_lea.hbm %s900_s2, 2048 }
  0x27   :  { %p697_p2 = scmp.ne.s32.totalorder %s900_s2, %s696_s21  ;;  %p700_p3 = scmp.lt.u32.totalorder %s696_s21, %s900_s2 }
  0x29   :  { %p702_p4 = pnand %p700_p3, %p697_p2 }
  0x2b   :  { %705 = shalt.err (!%p702_p4)
}
  0x2c   :  { %s706_s0 = scalar_lea.vmem %s43_s15, 2048  ;;  %p711_p6 = scmp.lt.s32.totalorder %s43_s15, %s43_s15 }
  0x2d   :  { %p707_p5 = scmp.ne.s32.totalorder %s43_s15, %s706_s0  ;;  %p712_p7 = scmp.lt.s32.totalorder %s706_s0, %s706_s0 }
  0x2f   :  { %p713_p8 = por %p712_p7, %p711_p6 }
  0x31   :  { %p714_p9 = pnand %p713_p8, %p707_p5 }
  0x33   :  { %717 = shalt.err (!%p714_p9)
}
  0x34   :  { %48 = dma.hbm_to_vmem [thread:$0]  %s900_s2, 2048, %s43_s15, [#allocation7], %s772_s27, %s772_s27, %s773_s28  }
  0x35   :  { %s718_s5 = scalar_lea.hbm %s901_s3, 1280 }
  0x36   :  { %p719_p10 = scmp.ne.s32.totalorder %s901_s3, %s718_s5  ;;  %p722_p11 = scmp.lt.u32.totalorder %s718_s5, %s901_s3 }
  0x38   :  { %p724_p12 = pnand %p722_p11, %p719_p10 }
  0x3a   :  { %727 = shalt.err (!%p724_p12)
}
  0x3b   :  { %s728_s10 = scalar_lea.vmem %s839_s17, 1280  ;;  %p733_p0 = scmp.lt.s32.totalorder %s839_s17, %s839_s17 }
  0x3c   :  { %p729_p13 = scmp.ne.s32.totalorder %s839_s17, %s728_s10  ;;  %p734_p1 = scmp.lt.s32.totalorder %s728_s10, %s728_s10 }
  0x3e   :  { %p735_p2 = por %p734_p1, %p733_p0 }
  0x40   :  { %p736_p3 = pnand %p735_p2, %p729_p13 }
  0x42   :  { %739 = shalt.err (!%p736_p3)
}
  0x43   :  { %60 = dma.hbm_to_vmem [thread:$0]  %s901_s3, 1280, %s839_s17, [#allocation10], %s772_s27, %s772_s27, %s773_s28  }
  0x44   :  { %762 = dma.done.wait [#allocation4], 256  }
  0x45   :  { %763 = vsyncadd [#allocation4], 4294967040 }
  0x46   :  { %764 = dma.done.wait [#allocation7], 2304  }
  0x47   :  { %765 = vsyncadd [#allocation7], 4294964992 }
  0x48   :  { %766 = dma.done.wait [#allocation10], 1280  }
  0x49   :  { %767 = vsyncadd [#allocation10], 4294966016  ;;  %v103_v0 = vld [vmem:[#allocation8] sm:$0xff]  ;;  %v104_v1 = vld [vmem:[#allocation8 + $0x8] sm:$0xff]  ;;  %vm244_vm0 = vcmask 654336   ;;  %s776_s3 = smov [#allocation11]  }
  0x4a   :  { %v105_v2 = vld [vmem:[#allocation8 + $0x10] sm:$0xff]  ;;  %v589_v3 = vpack.c.bf16 %v104_v1, %v103_v0  ;;  %v106_v4 = vld [vmem:[#allocation8 + $0x18] sm:$0xff]  ;;  %v107_v6 = vld [vmem:[#allocation8 + $0x20] sm:$0xff]  ;;  %s440_s27 = sshll.u32 %s776_s3, 4  ;;  %s441_s27 = int_to_ptr.vmem [resolvable:$true] %s440_s27 }
  0x4b   :  { %v593_v5 = vpack.c.bf16 %v106_v4, %v105_v2  ;;  %v108_v7 = vld [vmem:[#allocation8 + $0x28] sm:$0xff]  ;;  %v73_v9 = vld [vmem:[#allocation3] sm:$0xff]  ;;  %v109_v10 = vld [vmem:[#allocation8 + $0x30] sm:$0xff]  ;;  %s740_s28 = scalar_lea.vmem %s441_s27, 16  ;;  %s744_s12 = scalar_lea.vmem %s441_s27, 32 }
  0x4c   :  { %590 = vmatprep.subr.bf16.mxu0 %v589_v3  ;;  %v597_v8 = vpack.c.bf16 %v108_v7, %v107_v6  ;;  %v110_v11 = vld [vmem:[#allocation8 + $0x38] sm:$0xff]  ;;  %539 = vmatprep.mubr.f32.mxu0 %v73_v9  ;;  %v111_v13 = vld [vmem:[#allocation8 + $0x40] sm:$0xff]  ;;  %v112_v14 = vld [vmem:[#allocation8 + $0x48] sm:$0xff]  ;;  %v81_v28 = vmul.f32 %v73_v9, %v73_v9  ;;  %p741_p4 = scmp.ne.s32.totalorder %s441_s27, %s740_s28  ;;  %p745_p5 = scmp.lt.s32.totalorder %s441_s27, %s441_s27 }
  0x4d   :  { %592 = vmatpush3.bf16.msra.mxu0 %v589_v3  ;;  %v601_v12 = vpack.c.bf16 %v110_v11, %v109_v10  ;;  %v605_v15 = vpack.c.bf16 %v112_v14, %v111_v13  ;;  %v113_v16 = vld [vmem:[#allocation8 + $0x50] sm:$0xff]  ;;  %v114_v17 = vld [vmem:[#allocation8 + $0x58] sm:$0xff]  ;;  %v115_v19 = vld [vmem:[#allocation8 + $0x60] sm:$0xff]  ;;  %p746_p6 = scmp.lt.s32.totalorder %s744_s12, %s740_s28 }
  0x4e   :  { %594 = vmatprep.subr.bf16.mxu0 %v593_v5  ;;  %v609_v18 = vpack.c.bf16 %v114_v17, %v113_v16  ;;  %v116_v20 = vld [vmem:[#allocation8 + $0x68] sm:$0xff]  ;;  %v117_v22 = vld [vmem:[#allocation8 + $0x70] sm:$0xff]  ;;  %v118_v23 = vld [vmem:[#allocation8 + $0x78] sm:$0xff] }
  0x4f   :  { %v613_v21 = vpack.c.bf16 %v116_v20, %v115_v19  ;;  %v617_v24 = vpack.c.bf16 %v118_v23, %v117_v22  ;;  %v74_v25 = vld [vmem:[#allocation3 + $0x8] sm:$0xff]  ;;  %v75_v26 = vld [vmem:[#allocation6] sm:$0xff]  ;;  %v76_v27 = vld [vmem:[#allocation6 + $0x8] sm:$0xff]  ;;  %p747_p7 = por %p746_p6, %p745_p5 }
  0x50   :  { %v82_v29 = vmul.f32 %v74_v25, %v74_v25  ;;  %v85_v30 = vmul.f32 %v75_v26, %v75_v26  ;;  %v86_v31 = vmul.f32 %v76_v27, %v76_v27  ;;  %v89_v32 = vmul.f32 %v75_v26, %v73_v9  ;;  %v234_v34 = vld [vmem:[#allocation9] sm:$0xff]  ;;  %v235_v50 = vld [vmem:[#allocation9 + $0x8] sm:$0xff]  ;;  %v236_v51 = vld [vmem:[#allocation9 + $0x10] sm:$0xff] }
  0x51   :  { %596 = vmatpush3.bf16.msra.mxu0 %v593_v5  ;;  %v90_v33 = vmul.f32 %v76_v27, %v74_v25  ;;  %574 = vmatprep.mubr.msk.f32.mxu1 %vm244_vm0, %v234_v34  ;;  %v237_v52 = vld [vmem:[#allocation9 + $0x18] sm:$0xff]  ;;  %v238_v53 = vld [vmem:[#allocation9 + $0x20] sm:$0xff]  ;;  %v239_v54 = vld [vmem:[#allocation9 + $0x28] sm:$0xff]  ;;  %p748_p8 = pnand %p747_p7, %p741_p4 }
  0x52   :  { %598 = vmatprep.subr.bf16.mxu0 %v597_v8  ;;  %v240_v55 = vld [vmem:[#allocation9 + $0x30] sm:$0xff]  ;;  %v241_v56 = vld [vmem:[#allocation9 + $0x38] sm:$0xff]  ;;  %v242_v57 = vld [vmem:[#allocation9 + $0x40] sm:$0xff] }
  0x53   :  { %v243_v58 = vld [vmem:[#allocation9 + $0x48] sm:$0xff] }
  0x55   :  { %600 = vmatpush3.bf16.msra.mxu0 %v597_v8 }
  0x56   :  { %602 = vmatprep.subr.bf16.mxu0 %v601_v12 }
  0x59   :  { %604 = vmatpush3.bf16.msra.mxu0 %v601_v12 }
  0x5a   :  { %606 = vmatprep.subr.bf16.mxu0 %v605_v15 }
  0x5d   :  { %608 = vmatpush3.bf16.msra.mxu0 %v605_v15 }
  0x5e   :  { %610 = vmatprep.subr.bf16.mxu0 %v609_v18 }
  0x61   :  { %612 = vmatpush3.bf16.msra.mxu0 %v609_v18 }
  0x62   :  { %614 = vmatprep.subr.bf16.mxu0 %v613_v21 }
  0x65   :  { %616 = vmatpush3.bf16.msra.mxu0 %v613_v21 }
  0x66   :  { %618 = vmatprep.subr.bf16.mxu0 %v617_v24 }
  0x69   :  { %620 = vmatpush3.bf16.msra.mxu0 %v617_v24 }
  0x6c   :  { %540 = vmatmul.mubr.f32.vlgmr.msra.gmra.mrb[0].mxu0 %v74_v25 }
  0x6d   :  { %542 = vmatprep.mubr.f32.mxu0 %v75_v26 }
  0x70   :  { %543 = vmatmul.mubr.f32.gmra.mrb[2].mxu0 %v76_v27 }
  0x71   :  { %545 = vmatprep.mubr.f32.mxu0 %v81_v28 }
  0x74   :  { %546 = vmatmul.mubr.f32.gmra.mrb[4].mxu0 %v82_v29 }
  0x75   :  { %548 = vmatprep.mubr.f32.mxu0 %v85_v30 }
  0x78   :  { %549 = vmatmul.mubr.f32.gmra.mrb[6].mxu0 %v86_v31 }
  0x79   :  { %551 = vmatprep.mubr.f32.mxu0 %v89_v32 }
  0x7c   :  { %552 = vmatmul.mubr.f32.gmra.mrb[8].mxu0 %v90_v33 }
 0x13f   :  { %v541_v35 = vpop.f32.mrb[0].mxu0 }
 0x140   :  { %v185_v36 = vpop.f32.mrb[1].mxu0 }
 0x141   :  { %v621_v37 = vpack.c.bf16 %v541_v35, %v185_v36 }
 0x143   :  { %v544_v38 = vpop.f32.mrb[2].mxu0  ;;  %622 = vmatprep.subr.bf16.mxu1 %v621_v37 }
 0x144   :  { %v195_v39 = vpop.f32.mrb[3].mxu0  ;;  %624 = vmatpush3.bf16.msra.mxu1 %v621_v37 }
 0x145   :  { %v625_v40 = vpack.c.bf16 %v544_v38, %v195_v39 }
 0x147   :  { %v547_v41 = vpop.f32.mrb[4].mxu0  ;;  %626 = vmatprep.subr.bf16.mxu1 %v625_v40 }
 0x148   :  { %v205_v42 = vpop.f32.mrb[5].mxu0  ;;  %628 = vmatpush3.bf16.msra.mxu1 %v625_v40 }
 0x149   :  { %v629_v43 = vpack.c.bf16 %v547_v41, %v205_v42 }
 0x14b   :  { %v550_v44 = vpop.f32.mrb[6].mxu0  ;;  %630 = vmatprep.subr.bf16.mxu1 %v629_v43 }
 0x14c   :  { %v215_v45 = vpop.f32.mrb[7].mxu0  ;;  %632 = vmatpush3.bf16.msra.mxu1 %v629_v43 }
 0x14d   :  { %v633_v46 = vpack.c.bf16 %v550_v44, %v215_v45 }
 0x14f   :  { %v553_v47 = vpop.f32.mrb[8].mxu0  ;;  %634 = vmatprep.subr.bf16.mxu1 %v633_v46 }
 0x150   :  { %v225_v48 = vpop.f32.mrb[9].mxu0  ;;  %636 = vmatpush3.bf16.msra.mxu1 %v633_v46 }
 0x151   :  { %v637_v49 = vpack.c.bf16 %v553_v47, %v225_v48 }
 0x153   :  { %638 = vmatprep.subr.bf16.mxu1 %v637_v49 }
 0x154   :  { %640 = vmatpush3.bf16.msra.mxu1 %v637_v49 }
 0x157   :  { %575 = vmatmul.mubr.msk.f32.vlgmr.msra.gmra.mrb[0].mxu1 %vm244_vm0, %v235_v50 }
 0x158   :  { %577 = vmatprep.mubr.msk.f32.mxu1 %vm244_vm0, %v236_v51 }
 0x15b   :  { %578 = vmatmul.mubr.msk.f32.gmra.mrb[2].mxu1 %vm244_vm0, %v237_v52 }
 0x15c   :  { %580 = vmatprep.mubr.msk.f32.mxu1 %vm244_vm0, %v238_v53 }
 0x15f   :  { %581 = vmatmul.mubr.msk.f32.gmra.mrb[4].mxu1 %vm244_vm0, %v239_v54 }
 0x160   :  { %583 = vmatprep.mubr.msk.f32.mxu1 %vm244_vm0, %v240_v55 }
 0x163   :  { %584 = vmatmul.mubr.msk.f32.gmra.mrb[6].mxu1 %vm244_vm0, %v241_v56 }
 0x164   :  { %586 = vmatprep.mubr.msk.f32.mxu1 %vm244_vm0, %v242_v57 }
 0x167   :  { %587 = vmatmul.mubr.msk.f32.gmra.mrb[8].mxu1 %vm244_vm0, %v243_v58 }
 0x22a   :  { %v576_v59 = vpop.f32.mrb[0].mxu1 }
 0x22b   :  { %v341_v60 = vpop.f32.mrb[1].mxu1  ;;  %v391_v62 = vmul.f32 %v576_v59, %v576_v59 }
 0x22c   :  { %v390_v2 = vmul.f32 %v341_v60, %v341_v60 }
 0x22e   :  { %v579_v61 = vpop.f32.mrb[2].mxu1 }
 0x22f   :  { %v393_v63 = vmul.f32 %v579_v61, %v579_v61  ;;  %v395_v0 = vmul.f32 %v579_v61, %v576_v59  ;;  %v351_v1 = vpop.f32.mrb[3].mxu1 }
 0x230   :  { %v392_v3 = vmul.f32 %v351_v1, %v351_v1  ;;  %v394_v4 = vmul.f32 %v351_v1, %v341_v60 }
 0x231   :  { %v413_v5 = vadd.f32 %v393_v63, %v391_v62  ;;  %v403_v18 = vmul.f32 2.0, %v395_v0 }
 0x232   :  { %v412_v6 = vadd.f32 %v392_v3, %v390_v2  ;;  %v582_v7 = vpop.f32.mrb[4].mxu1  ;;  %v402_v23 = vmul.f32 2.0, %v394_v4 }
 0x233   :  { %v397_v8 = vsub.f32 %v582_v7, %v391_v62  ;;  %v361_v9 = vpop.f32.mrb[5].mxu1  ;;  %v415_v19 = vadd.f32 0.0001, %v413_v5  ;;  %v405_v31 = vadd.f32 0.0001, %v403_v18 }
 0x234   :  { %v396_v10 = vsub.f32 %v361_v9, %v390_v2  ;;  %v414_v24 = vadd.f32 0.0001, %v412_v6  ;;  %v404_v33 = vadd.f32 0.0001, %v402_v23 }
 0x236   :  { %v585_v11 = vpop.f32.mrb[6].mxu1 }
 0x237   :  { %v399_v12 = vsub.f32 %v585_v11, %v393_v63  ;;  %v371_v13 = vpop.f32.mrb[7].mxu1 }
 0x238   :  { %v398_v14 = vsub.f32 %v371_v13, %v392_v3 }
 0x239   :  { %v417_v15 = vadd.f32 %v399_v12, %v397_v8 }
 0x23a   :  { %v416_v16 = vadd.f32 %v398_v14, %v396_v10  ;;  %v588_v17 = vpop.f32.mrb[8].mxu1 }
 0x23b   :  { %v419_v20 = vadd.f32 0.0009, %v417_v15  ;;  %v401_v21 = vsub.f32 %v588_v17, %v395_v0  ;;  %v381_v22 = vpop.f32.mrb[9].mxu1 }
 0x23c   :  { %v418_v25 = vadd.f32 0.0009, %v416_v16  ;;  %v400_v26 = vsub.f32 %v381_v22, %v394_v4 }
 0x23d   :  { %v421_v27 = vmul.f32 %v419_v20, %v415_v19  ;;  %v407_v28 = vmul.f32 2.0, %v401_v21 }
 0x23e   :  { %v420_v29 = vmul.f32 %v418_v25, %v414_v24  ;;  %v406_v30 = vmul.f32 2.0, %v400_v26 }
 0x23f   :  { %648 = vrcp.f32 %v421_v27  ;;  %v409_v32 = vadd.f32 0.0009, %v407_v28 }
 0x240   :  { %650 = vrcp.f32 %v420_v29  ;;  %v408_v34 = vadd.f32 0.0009, %v406_v30 }
 0x241   :  { %v411_v35 = vmul.f32 %v409_v32, %v405_v31 }
 0x242   :  { %v410_v36 = vmul.f32 %v408_v34, %v404_v33 }
 0x249   :  { %v649_v37 = vpop.eup %648 }
 0x24a   :  { %v651_v38 = vpop.eup %650  ;;  %v425_v39 = vmul.f32 %v649_v37, %v411_v35 }
 0x24b   :  { %v424_v40 = vmul.f32 %v651_v38, %v410_v36 }
 0x24d   :  { %v426_v41 = vadd.f32 %v425_v39, %v424_v40 }
 0x24f   :  { %v427_v42 = vrot.slane %v426_v41, 4 }
 0x251   :  { %v428_v43 = vadd.f32 %v427_v42, %v426_v41 }
 0x253   :  { %v429_v44 = vrot.slane %v428_v43, 2 }
 0x255   :  { %v430_v45 = vadd.f32 %v429_v44, %v428_v43 }
 0x257   :  { %v431_v46 = vrot.slane %v430_v45, 1 }
 0x259   :  { %v432_v47 = vadd.f32 %v431_v46, %v430_v45 }
 0x25b   :  { %433 = vst [vmem:[#allocation11] sm:$0x1] %v432_v47 }
 0x25c   :  { %751 = shalt.err (!%p748_p8)
}
 0x25d   :  { %s752_s14 = scalar_lea.hbm %s902_s4, 16 }
 0x25e   :  { %p753_p9 = scmp.ne.s32.totalorder %s902_s4, %s752_s14  ;;  %p756_p10 = scmp.lt.u32.totalorder %s752_s14, %s902_s4 }
 0x260   :  { %p758_p11 = pnand %p756_p10, %p753_p9 }
 0x262   :  { %761 = shalt.err (!%p758_p11)
}
 0x263   :  { %443 = dma.vmem_to_hbm [thread:$0]  %s441_s27, 16, %s902_s4, [#allocation5]  }
 0x264   :  { %768 = dma.done.wait [#allocation5], 16  }
 0x265   :  { %769 = vsyncadd [#allocation5], 4294967280 }
 0x266   :  { %447 = vsyncpa [#allocation4], 1 }
 0x267   :  { %448 = vsyncpa [#allocation7], 1 }
 0x268   :  { %449 = vsyncpa [#allocation10], 1 }
 0x269   :  { %450 = vsyncpa [#allocation5], 1 }

</bundles_post_ra>
